<compile_context>
chip_gen: v7x
topology: tpu7x:2x2x1
jax: 0.10.0
libtpu: 0.0.40
codegen_flags: <defaults>
</compile_context>

<pallas_src>
import jax
import jax.numpy as jnp
from jax.experimental import pallas as pl
from jax.experimental.pallas import tpu as pltpu  # noqa: F401  (TPU backend)


def _robustnet_kernel(x_ref, w1_ref, b1_ref, mask_ref, w2_ref, b2_ref, o_ref):
    """Single-invocation fused RobustNet forward (all replicas at once).

    x_ref   : (B, D)      bf16   flattened input (all replicas' batch chunks)
    w1_ref  : (D, y*H)    bf16   replica-concatenated first-layer weights
    b1_ref  : (1, y*H)    f32    replica-concatenated first-layer bias
    mask_ref: (B, y*H)    f32    replica-diagonal mask (row b keeps block b//Bp)
    w2_ref  : (y*H, Cpad) bf16   replica-stacked second-layer weights (lane-padded)
    b2_ref  : (B, Cpad)   f32    per-row second-layer bias (lane-padded)
    o_ref   : (B, Cpad)   f32    concatenated outputs (lane-dense stores)
    """
    # Layer 1, fused over replicas: one MXU pass, K = D, N = y*H lanes.
    h = jnp.dot(x_ref[...], w1_ref[...], preferred_element_type=jnp.float32)
    h = jnp.maximum(h + b1_ref[...], 0.0)           # f32 epilogue (v5e-safe)

    # Keep only each row's own replica hidden block, then back to bf16 for MXU.
    hb = (h * mask_ref[...]).astype(jnp.bfloat16)

    # Layer 2, fused over replicas: one MXU pass, K = y*H, N = Cpad lanes.
    o = jnp.dot(hb, w2_ref[...], preferred_element_type=jnp.float32)
    o_ref[...] = o + b2_ref[...]


def robustnet_forward(x_nchw, params, y):
    """RobustNet.forward(x, split_input=True, concatenate_output=True)."""
    w1, b1, w2, b2 = params                 # (y,D,H) (y,1,H) (y,H,C2) (y,1,C2)
    B = x_nchw.shape[0]
    assert B % y == 0, "batch must be divisible by the number of replicas"
    Bp = B // y
    D = w1.shape[1]
    H = w1.shape[2]
    C2 = w2.shape[2]
    yH = y * H

    LANE = 128
    Cpad = ((C2 + LANE - 1) // LANE) * LANE          # lane-dense output width

    # Flatten NCHW image -> feature vector (same as torch Flatten); bf16 for MXU.
    x_flat = x_nchw.reshape(B, D).astype(jnp.bfloat16)

    # Layer 1: concatenate replica W1/b1 along the hidden axis (col = r*H + h).
    w1cat = jnp.transpose(w1, (1, 0, 2)).reshape(D, yH).astype(jnp.bfloat16)
    b1cat = b1.reshape(1, yH).astype(jnp.float32)

    # Layer 2: stack replica W2 along the hidden axis (row r*H + h = w2[r, h]),
    # lane-pad the class axis to Cpad.
    w2pad = jnp.pad(w2, ((0, 0), (0, 0), (0, Cpad - C2)))
    w2cat = w2pad.reshape(yH, Cpad).astype(jnp.bfloat16)
    b2pad = jnp.pad(b2, ((0, 0), (0, 0), (0, Cpad - C2))).reshape(y, Cpad)
    b2rows = jnp.repeat(b2pad, Bp, axis=0).astype(jnp.float32)   # (B, Cpad)

    # Replica-diagonal mask: row b (replica b // Bp) keeps only its own hidden
    # block.  Static shapes -> a constant; built in the wrapper (zero kernel cost).
    row_rep = jnp.arange(B) // Bp
    col_rep = jnp.arange(yH) // H
    mask = (row_rep[:, None] == col_rep[None, :]).astype(jnp.float32)

    # Single invocation, no grid: every operand is whole-array resident in VMEM.
    out_pad = pl.pallas_call(
        _robustnet_kernel,
        out_shape=jax.ShapeDtypeStruct((B, Cpad), jnp.float32),
    )(x_flat, w1cat, b1cat, mask, w2cat, b2rows)

    # Rows are already in torch.cat order (replica 0 chunk, replica 1 chunk, ...);
    # just drop the lane padding.
    return out_pad[:, :C2]


def init_params(key, y, D, H, C2):
    """Deterministic per-replica weights (PyTorch nn.Linear-style uniform)."""
    k1, k2, k3, k4 = jax.random.split(key, 4)
    lim1 = 1.0 / jnp.sqrt(D)
    lim2 = 1.0 / jnp.sqrt(H)
    w1 = jax.random.uniform(k1, (y, D, H), jnp.float32, -lim1, lim1)
    b1 = jax.random.uniform(k2, (y, 1, H), jnp.float32, -lim1, lim1)
    w2 = jax.random.uniform(k3, (y, H, C2), jnp.float32, -lim2, lim2)
    b2 = jax.random.uniform(k4, (y, 1, C2), jnp.float32, -lim2, lim2)
    return w1, b1, w2, b2


def reference_forward(x_nchw, params, y):
    """Plain-JAX reference with the same bf16-input / f32-accumulate math."""
    w1, b1, w2, b2 = params
    B = x_nchw.shape[0]
    D = w1.shape[1]
    xf = x_nchw.reshape(B, D).astype(jnp.bfloat16).reshape(y, B // y, D)
    h = jnp.einsum("ybd,ydh->ybh", xf, w1.astype(jnp.bfloat16),
                   preferred_element_type=jnp.float32) + b1
    h = jnp.maximum(h, 0.0)
    o = jnp.einsum("ybh,yhc->ybc", h.astype(jnp.bfloat16),
                   w2.astype(jnp.bfloat16),
                   preferred_element_type=jnp.float32) + b2
    return o.reshape(B, -1)


if __name__ == "__main__":
    # Small shapes: y=3 replicas, batch=6 (2 per replica), NCHW = (6,4,16,16)
    y = 3
    B, C, Himg, Wimg = 6, 4, 16, 16
    D = C * Himg * Wimg          # 1024 flattened features
    H = 32                       # hidden
    C2 = 10                      # classes

    key = jax.random.PRNGKey(0)
    kx, kp = jax.random.split(key)
    x = jax.random.normal(kx, (B, C, Himg, Wimg), jnp.float32)
    params = init_params(kp, y, D, H, C2)

    out = robustnet_forward(x, params, y)
    out = jax.block_until_ready(out)

    ref = reference_forward(x, params, y)
    assert out.shape == (B, C2), out.shape
    assert jnp.allclose(out, ref, atol=2e-3, rtol=2e-3), "mismatch vs reference"

    print("KERNEL_OK")
</pallas_src>

<mosaic_0001>
module attributes {stable_mosaic.version = 11 : i64} {
  func.func @_robustnet_kernel(%arg0: memref<6x1024xbf16, #tpu.memory_space<vmem>>, %arg1: memref<1024x96xbf16, #tpu.memory_space<vmem>>, %arg2: memref<1x96xf32, #tpu.memory_space<vmem>>, %arg3: memref<6x96xf32, #tpu.memory_space<vmem>>, %arg4: memref<96x128xbf16, #tpu.memory_space<vmem>>, %arg5: memref<6x128xf32, #tpu.memory_space<vmem>>, %arg6: memref<6x128xf32, #tpu.memory_space<vmem>>) attributes {dimension_semantics = [], scalar_prefetch = 0 : i64, scratch_operands = 0 : i64, tpu.core_type = #tpu.core_type<tc>} {
    %c0 = arith.constant 0 : index
    %c0_0 = arith.constant 0 : index
    %0 = vector.load %arg0[%c0, %c0_0] : memref<6x1024xbf16, #tpu.memory_space<vmem>>, vector<6x1024xbf16>
    %c0_1 = arith.constant 0 : index
    %c0_2 = arith.constant 0 : index
    %1 = vector.load %arg1[%c0_1, %c0_2] : memref<1024x96xbf16, #tpu.memory_space<vmem>>, vector<1024x96xbf16>
    %cst = arith.constant dense<0.000000e+00> : vector<6x96xf32>
    %2 = tpu.matmul %0, %1, %cst {dimension_numbers = #tpu.dot_dimension_numbers<[1], [0], [0], [1], [0, 0, 1, 1], [], []>} : vector<6x1024xbf16>, vector<1024x96xbf16>, vector<6x96xf32> -> vector<6x96xf32>
    %c0_3 = arith.constant 0 : index
    %c0_4 = arith.constant 0 : index
    %3 = vector.load %arg2[%c0_3, %c0_4] : memref<1x96xf32, #tpu.memory_space<vmem>>, vector<1x96xf32>
    %4 = vector.broadcast %3 : vector<1x96xf32> to vector<6x96xf32>
    %5 = arith.addf %2, %4 : vector<6x96xf32>
    %cst_5 = arith.constant 0.000000e+00 : f32
    %6 = vector.broadcast %cst_5 : f32 to vector<6x96xf32>
    %7 = arith.maximumf %5, %6 : vector<6x96xf32>
    %c0_6 = arith.constant 0 : index
    %c0_7 = arith.constant 0 : index
    %8 = vector.load %arg3[%c0_6, %c0_7] : memref<6x96xf32, #tpu.memory_space<vmem>>, vector<6x96xf32>
    %9 = arith.mulf %7, %8 : vector<6x96xf32>
    %10 = arith.truncf %9 : vector<6x96xf32> to vector<6x96xbf16>
    %c0_8 = arith.constant 0 : index
    %c0_9 = arith.constant 0 : index
    %11 = vector.load %arg4[%c0_8, %c0_9] : memref<96x128xbf16, #tpu.memory_space<vmem>>, vector<96x128xbf16>
    %cst_10 = arith.constant dense<0.000000e+00> : vector<6x128xf32>
    %12 = tpu.matmul %10, %11, %cst_10 {dimension_numbers = #tpu.dot_dimension_numbers<[1], [0], [0], [1], [0, 0, 1, 1], [], []>} : vector<6x96xbf16>, vector<96x128xbf16>, vector<6x128xf32> -> vector<6x128xf32>
    %c0_11 = arith.constant 0 : index
    %c0_12 = arith.constant 0 : index
    %13 = vector.load %arg5[%c0_11, %c0_12] : memref<6x128xf32, #tpu.memory_space<vmem>>, vector<6x128xf32>
    %14 = arith.addf %12, %13 : vector<6x128xf32>
    %c0_13 = arith.constant 0 : index
    %c0_14 = arith.constant 0 : index
    %15 = vector.load %arg6[%c0_13, %c0_14] : memref<6x128xf32, #tpu.memory_space<vmem>>, vector<6x128xf32>
    tpu.vector_store %arg6[%c0_13, %c0_14], %14 {strides = array<i32>} : memref<6x128xf32, #tpu.memory_space<vmem>>, vector<6x128xf32>,
    return
  }
}

</mosaic_0001>

<bundles_post_ra>
// kernel: tpu_custom_call.1
= control target key start
LH: loop header
LB: loop body
LE: loop exit
PB: predicated region body
PF: predicated region fallthrough
CT: control target
= control target key end

     0   :  { %s1425_s0 = inlined_call_operand.vmem [shape: bf16[6,1024], index: 0, kind: input, shape index: {}]   ;;  %s1426_s1 = inlined_call_operand.vmem [shape: bf16[1024,96], index: 1, kind: input, shape index: {}]   ;;  %s1427_s2 = inlined_call_operand.vmem [shape: f32[1,96], index: 2, kind: input, shape index: {}]   ;;  %s1428_s3 = inlined_call_operand.vmem [shape: f32[6,96], index: 3, kind: input, shape index: {}]   ;;  %s1429_s4 = inlined_call_operand.vmem [shape: bf16[96,128], index: 4, kind: input, shape index: {}]   ;;  %s1430_s5 = inlined_call_operand.vmem [shape: f32[6,128], index: 5, kind: input, shape index: {}]   ;;  %s1431_s6 = inlined_call_operand.hbm [shape: f32[6,128], index: 6, kind: output, shape index: {}]  }
   0x1   :  { %v1042_v0 = vld [vmem:[%s1426_s1 + $0x40] sm:$0xff]   ;;  %v1046_v4 = vld [vmem:[%s1426_s1 + $0x48] sm:$0xff]   ;;  %v1050_v8 = vld [vmem:[%s1426_s1 + $0x50] sm:$0xff]  }
   0x2   :  { %v1043_v1 = vld [vmem:[%s1426_s1 + $0xc0] sm:$0xff]   ;;  %928 = vmatprep.subr.bf16.mxu0 %v1042_v0  ;;  %v1047_v5 = vld [vmem:[%s1426_s1 + $0xc8] sm:$0xff]   ;;  %v1051_v9 = vld [vmem:[%s1426_s1 + $0xd0] sm:$0xff]  }
   0x3   :  { %v1044_v2 = vld [vmem:[%s1426_s1] sm:$0xff]   ;;  %950 = vmatprep.subr.bf16.mxu1 %v1043_v1  ;;  %v1048_v6 = vld [vmem:[%s1426_s1 + $0x8] sm:$0xff]   ;;  %v1052_v10 = vld [vmem:[%s1426_s1 + $0x10] sm:$0xff]  }
   0x4   :  { %v1045_v3 = vld [vmem:[%s1426_s1 + $0x80] sm:$0xff]   ;;  %929 = vmatpush3.bf16.msra.mxu0 %v1044_v2  ;;  %v1049_v7 = vld [vmem:[%s1426_s1 + $0x88] sm:$0xff]   ;;  %v1053_v11 = vld [vmem:[%s1426_s1 + $0x90] sm:$0xff]  }
   0x5   :  { %951 = vmatpush3.bf16.msra.mxu1 %v1045_v3  ;;  %930 = vmatprep.subr.bf16.mxu0 %v1046_v4  ;;  %v1054_v12 = vld [vmem:[%s1426_s1 + $0x58] sm:$0xff]   ;;  %v1058_v16 = vld [vmem:[%s1426_s1 + $0x60] sm:$0xff]   ;;  %v1062_v20 = vld [vmem:[%s1426_s1 + $0x68] sm:$0xff]  }
   0x6   :  { %952 = vmatprep.subr.bf16.mxu1 %v1047_v5  ;;  %v1055_v13 = vld [vmem:[%s1426_s1 + $0xd8] sm:$0xff]   ;;  %v1059_v17 = vld [vmem:[%s1426_s1 + $0xe0] sm:$0xff]   ;;  %v1063_v21 = vld [vmem:[%s1426_s1 + $0xe8] sm:$0xff]  }
   0x7   :  { %v1056_v14 = vld [vmem:[%s1426_s1 + $0x18] sm:$0xff]   ;;  %v1060_v18 = vld [vmem:[%s1426_s1 + $0x20] sm:$0xff]   ;;  %v1064_v22 = vld [vmem:[%s1426_s1 + $0x28] sm:$0xff]  }
   0x8   :  { %931 = vmatpush3.bf16.msra.mxu0 %v1048_v6  ;;  %v1057_v15 = vld [vmem:[%s1426_s1 + $0x98] sm:$0xff]   ;;  %v1061_v19 = vld [vmem:[%s1426_s1 + $0xa0] sm:$0xff]   ;;  %v1065_v23 = vld [vmem:[%s1426_s1 + $0xa8] sm:$0xff]  }
   0x9   :  { %953 = vmatpush3.bf16.msra.mxu1 %v1049_v7  ;;  %932 = vmatprep.subr.bf16.mxu0 %v1050_v8  ;;  %v1066_v24 = vld [vmem:[%s1426_s1 + $0x70] sm:$0xff]   ;;  %v1070_v28 = vld [vmem:[%s1426_s1 + $0x78] sm:$0xff]   ;;  %v25_v32 = vld [vmem:[%s1425_s0] sm:$0x77] }
   0xa   :  { %954 = vmatprep.subr.bf16.mxu1 %v1051_v9  ;;  %v1067_v25 = vld [vmem:[%s1426_s1 + $0xf0] sm:$0xff]   ;;  %v1071_v29 = vld [vmem:[%s1426_s1 + $0xf8] sm:$0xff]   ;;  %v26_v33 = vld [vmem:[%s1425_s0 + $0x8] sm:$0x77]  ;;  %v849_v34 = vcombine.low %v25_v32, %v25_v32  ;;  %v850_v35 = vcombine.high %v25_v32, %v25_v32 }
   0xb   :  { %v1068_v26 = vld [vmem:[%s1426_s1 + $0x30] sm:$0xff]   ;;  %v1072_v30 = vld [vmem:[%s1426_s1 + $0x38] sm:$0xff]   ;;  %v851_v36 = vcombine.low %v26_v33, %v26_v33  ;;  %v852_v37 = vcombine.high %v26_v33, %v26_v33  ;;  %v1078_v38 = vld [vmem:[%s1426_s1 + $0x140] sm:$0xff]  }
   0xc   :  { %933 = vmatpush3.bf16.msra.mxu0 %v1052_v10  ;;  %v1069_v27 = vld [vmem:[%s1426_s1 + $0xb0] sm:$0xff]   ;;  %v1073_v31 = vld [vmem:[%s1426_s1 + $0xb8] sm:$0xff]   ;;  %v1079_v39 = vld [vmem:[%s1426_s1 + $0x1c0] sm:$0xff]   ;;  %608 = vmatprep.mubr.bf16.mxu0 %v850_v35 }
   0xd   :  { %955 = vmatpush3.bf16.msra.mxu1 %v1053_v11  ;;  %934 = vmatprep.subr.bf16.mxu0 %v1054_v12  ;;  %v1080_v40 = vld [vmem:[%s1426_s1 + $0x100] sm:$0xff]   ;;  %v1082_v42 = vld [vmem:[%s1426_s1 + $0x148] sm:$0xff]   ;;  %v1086_v46 = vld [vmem:[%s1426_s1 + $0x150] sm:$0xff]  }
   0xe   :  { %956 = vmatprep.subr.bf16.mxu1 %v1055_v13  ;;  %648 = vmatprep.mubr.bf16.mxu1 %v852_v37  ;;  %v1081_v41 = vld [vmem:[%s1426_s1 + $0x180] sm:$0xff]   ;;  %v1083_v43 = vld [vmem:[%s1426_s1 + $0x1c8] sm:$0xff]   ;;  %v1087_v47 = vld [vmem:[%s1426_s1 + $0x1d0] sm:$0xff]  }
   0xf   :  { %v1084_v44 = vld [vmem:[%s1426_s1 + $0x108] sm:$0xff]   ;;  %v1088_v48 = vld [vmem:[%s1426_s1 + $0x110] sm:$0xff]   ;;  %v1090_v50 = vld [vmem:[%s1426_s1 + $0x158] sm:$0xff]  }
  0x10   :  { %935 = vmatpush3.bf16.msra.mxu0 %v1056_v14  ;;  %v1085_v45 = vld [vmem:[%s1426_s1 + $0x188] sm:$0xff]   ;;  %v1089_v49 = vld [vmem:[%s1426_s1 + $0x190] sm:$0xff]   ;;  %v1091_v51 = vld [vmem:[%s1426_s1 + $0x1d8] sm:$0xff]  }
  0x11   :  { %957 = vmatpush3.bf16.msra.mxu1 %v1057_v15  ;;  %936 = vmatprep.subr.bf16.mxu0 %v1058_v16  ;;  %v1092_v52 = vld [vmem:[%s1426_s1 + $0x118] sm:$0xff]   ;;  %v1094_v54 = vld [vmem:[%s1426_s1 + $0x160] sm:$0xff]   ;;  %v1098_v58 = vld [vmem:[%s1426_s1 + $0x168] sm:$0xff]  }
  0x12   :  { %958 = vmatprep.subr.bf16.mxu1 %v1059_v17  ;;  %v1093_v53 = vld [vmem:[%s1426_s1 + $0x198] sm:$0xff]   ;;  %v1095_v55 = vld [vmem:[%s1426_s1 + $0x1e0] sm:$0xff]   ;;  %v1099_v59 = vld [vmem:[%s1426_s1 + $0x1e8] sm:$0xff]  }
  0x13   :  { %v1096_v56 = vld [vmem:[%s1426_s1 + $0x120] sm:$0xff]   ;;  %v1100_v60 = vld [vmem:[%s1426_s1 + $0x128] sm:$0xff]   ;;  %v1102_v62 = vld [vmem:[%s1426_s1 + $0x170] sm:$0xff]  }
  0x14   :  { %937 = vmatpush3.bf16.msra.mxu0 %v1060_v18  ;;  %v1097_v57 = vld [vmem:[%s1426_s1 + $0x1a0] sm:$0xff]   ;;  %v1101_v61 = vld [vmem:[%s1426_s1 + $0x1a8] sm:$0xff]   ;;  %v1103_v63 = vld [vmem:[%s1426_s1 + $0x1f0] sm:$0xff]  }
  0x15   :  { %959 = vmatpush3.bf16.msra.mxu1 %v1061_v19  ;;  %938 = vmatprep.subr.bf16.mxu0 %v1062_v20  ;;  %v1104_v0 = vld [vmem:[%s1426_s1 + $0x130] sm:$0xff]   ;;  %v1106_v2 = vld [vmem:[%s1426_s1 + $0x178] sm:$0xff]  }
  0x16   :  { %960 = vmatprep.subr.bf16.mxu1 %v1063_v21  ;;  %v1105_v1 = vld [vmem:[%s1426_s1 + $0x1b0] sm:$0xff]   ;;  %v1107_v3 = vld [vmem:[%s1426_s1 + $0x1f8] sm:$0xff]  }
  0x17   :  { %v1108_v4 = vld [vmem:[%s1426_s1 + $0x138] sm:$0xff]   ;;  %v27_v6 = vld [vmem:[%s1425_s0 + $0x10] sm:$0x77] }
  0x18   :  { %939 = vmatpush3.bf16.msra.mxu0 %v1064_v22  ;;  %v1109_v5 = vld [vmem:[%s1426_s1 + $0x1b8] sm:$0xff]   ;;  %v853_v7 = vcombine.low %v27_v6, %v27_v6  ;;  %v854_v8 = vcombine.high %v27_v6, %v27_v6 }
  0x19   :  { %961 = vmatpush3.bf16.msra.mxu1 %v1065_v23  ;;  %940 = vmatprep.subr.bf16.mxu0 %v1066_v24  ;;  %v28_v9 = vld [vmem:[%s1425_s0 + $0x18] sm:$0x77] }
  0x1a   :  { %962 = vmatprep.subr.bf16.mxu1 %v1067_v25  ;;  %v855_v10 = vcombine.low %v28_v9, %v28_v9  ;;  %v856_v11 = vcombine.high %v28_v9, %v28_v9 }
  0x1c   :  { %941 = vmatpush3.bf16.msra.mxu0 %v1068_v26 }
  0x1d   :  { %963 = vmatpush3.bf16.msra.mxu1 %v1069_v27  ;;  %942 = vmatprep.subr.bf16.mxu0 %v1070_v28 }
  0x1e   :  { %964 = vmatprep.subr.bf16.mxu1 %v1071_v29 }
  0x20   :  { %943 = vmatpush3.bf16.msra.mxu0 %v1072_v30 }
  0x21   :  { %965 = vmatpush3.bf16.msra.mxu1 %v1073_v31  ;;  %972 = vmatprep.subr.bf16.mxu0 %v1078_v38 }
  0x22   :  { %994 = vmatprep.subr.bf16.mxu1 %v1079_v39 }
  0x23   :  { %609 = vmatmul.mubr.bf16.vlgmr.msra.gmra.mrb[0].mxu0 %v849_v34 }
  0x24   :  { %649 = vmatmul.mubr.bf16.vlgmr.msra.gmra.mrb[0].mxu1 %v851_v36  ;;  %973 = vmatpush3.bf16.msra.mxu0 %v1080_v40 }
  0x25   :  { %995 = vmatpush3.bf16.msra.mxu1 %v1081_v41  ;;  %974 = vmatprep.subr.bf16.mxu0 %v1082_v42 }
  0x26   :  { %996 = vmatprep.subr.bf16.mxu1 %v1083_v43  ;;  %688 = vmatprep.mubr.bf16.mxu0 %v854_v8 }
  0x27   :  { %728 = vmatprep.mubr.bf16.mxu1 %v856_v11 }
  0x28   :  { %975 = vmatpush3.bf16.msra.mxu0 %v1084_v44 }
  0x29   :  { %997 = vmatpush3.bf16.msra.mxu1 %v1085_v45  ;;  %976 = vmatprep.subr.bf16.mxu0 %v1086_v46 }
  0x2a   :  { %998 = vmatprep.subr.bf16.mxu1 %v1087_v47 }
  0x2c   :  { %977 = vmatpush3.bf16.msra.mxu0 %v1088_v48 }
  0x2d   :  { %999 = vmatpush3.bf16.msra.mxu1 %v1089_v49  ;;  %978 = vmatprep.subr.bf16.mxu0 %v1090_v50 }
  0x2e   :  { %1000 = vmatprep.subr.bf16.mxu1 %v1091_v51 }
  0x30   :  { %979 = vmatpush3.bf16.msra.mxu0 %v1092_v52 }
  0x31   :  { %1001 = vmatpush3.bf16.msra.mxu1 %v1093_v53  ;;  %980 = vmatprep.subr.bf16.mxu0 %v1094_v54 }
  0x32   :  { %1002 = vmatprep.subr.bf16.mxu1 %v1095_v55 }
  0x34   :  { %981 = vmatpush3.bf16.msra.mxu0 %v1096_v56 }
  0x35   :  { %1003 = vmatpush3.bf16.msra.mxu1 %v1097_v57  ;;  %982 = vmatprep.subr.bf16.mxu0 %v1098_v58 }
  0x36   :  { %1004 = vmatprep.subr.bf16.mxu1 %v1099_v59 }
  0x38   :  { %983 = vmatpush3.bf16.msra.mxu0 %v1100_v60 }
  0x39   :  { %1005 = vmatpush3.bf16.msra.mxu1 %v1101_v61  ;;  %984 = vmatprep.subr.bf16.mxu0 %v1102_v62 }
  0x3a   :  { %1006 = vmatprep.subr.bf16.mxu1 %v1103_v63 }
  0x3c   :  { %985 = vmatpush3.bf16.msra.mxu0 %v1104_v0 }
  0x3d   :  { %1007 = vmatpush3.bf16.msra.mxu1 %v1105_v1  ;;  %986 = vmatprep.subr.bf16.mxu0 %v1106_v2 }
  0x3e   :  { %1008 = vmatprep.subr.bf16.mxu1 %v1107_v3 }
  0x40   :  { %987 = vmatpush3.bf16.msra.mxu0 %v1108_v4 }
  0x41   :  { %1009 = vmatpush3.bf16.msra.mxu1 %v1109_v5 }
  0x43   :  { %689 = vmatmul.mubr.bf16.vlgmr.msra.gmra.mrb[4].mxu0 %v853_v7 }
  0x44   :  { %729 = vmatmul.mubr.bf16.vlgmr.msra.gmra.mrb[4].mxu1 %v855_v10 }
  0x45   :  { %11 = vsyncpa [#allocation3], 0  ;;  %v1114_v12 = vld [vmem:[%s1429_s4] sm:$0xff]   ;;  %v1144_v13 = vmov 0.0   ;;  %v1115_v14 = vld [vmem:[%s1429_s4 + $0x8] sm:$0xff]   ;;  %vm1145_vm0 = vmmov 0  }
  0x46   :  { %1023 = vmatprep.subr.bf16.mxu0 %v1144_v13  ;;  %v1116_v15 = vld [vmem:[%s1429_s4 + $0x10] sm:$0xff]   ;;  %v1117_v16 = vld [vmem:[%s1429_s4 + $0x18] sm:$0xff]   ;;  %v1118_v17 = vld [vmem:[%s1429_s4 + $0x20] sm:$0xff]   ;;  %1035 = vmatprep.mubr.msk.bf16.mxu0 %vm1145_vm0, %v1144_v13  ;;  %vm789_vm1 = vcmask 785408   ;;  %s1146_s27 = smov [#allocation2]  }
  0x47   :  { %1024 = vmatpush3.bf16.msra.mxu0 %v1114_v12  ;;  %v1119_v18 = vld [vmem:[%s1429_s4 + $0x28] sm:$0xff]   ;;  %v848_v21 = vld [vmem:[%s1427_s2] ss:$0 sm:$0xff]  ;;  %s840_s28 = sshll.u32 %s1146_s27, 4  ;;  %s841_s28 = int_to_ptr.vmem [resolvable:$true] %s840_s28 }
  0x48   :  { %1025 = vmatprep.subr.bf16.mxu0 %v1144_v13  ;;  %v737_v44 = vld [vmem:[%s1428_s3] sm:$0x3f]  ;;  %s1120_s29 = scalar_lea.vmem %s841_s28, 128  ;;  %p1125_p1 = scmp.lt.s32.totalorder %s841_s28, %s841_s28 }
  0x49   :  { %v752_v48 = vld [vmem:[%s1430_s5] sm:$0x3f]  ;;  %p1121_p0 = scmp.ne.s32.totalorder %s841_s28, %s1120_s29  ;;  %p1126_p2 = scmp.lt.s32.totalorder %s1120_s29, %s1120_s29 }
  0x4b   :  { %1026 = vmatpush3.bf16.msra.mxu0 %v1115_v14  ;;  %p1127_p3 = por %p1126_p2, %p1125_p1 }
  0x4c   :  { %1027 = vmatprep.subr.bf16.mxu0 %v1144_v13 }
  0x4d   :  { %p1128_p4 = pnand %p1127_p3, %p1121_p0 }
  0x4f   :  { %1028 = vmatpush3.bf16.msra.mxu0 %v1116_v15 }
  0x50   :  { %1029 = vmatprep.subr.bf16.mxu0 %v1144_v13 }
  0x53   :  { %1030 = vmatpush3.bf16.msra.mxu0 %v1117_v16 }
  0x54   :  { %1031 = vmatprep.subr.bf16.mxu0 %v1144_v13 }
  0x57   :  { %1032 = vmatpush3.bf16.msra.mxu0 %v1118_v17 }
  0x58   :  { %1033 = vmatprep.subr.bf16.mxu0 %v1144_v13 }
  0x5b   :  { %1034 = vmatpush3.bf16.msra.mxu0 %v1119_v18 }
  0xf6   :  { %v944_v19 = vpop.f32.mrb[0].mxu0 }
  0xf7   :  { %v966_v20 = vpop.f32.mrb[0].mxu1  ;;  %v945_v22 = vpop.f32.mrb[1].mxu0 }
  0xf8   :  { %v967_v23 = vpop.f32.mrb[1].mxu1  ;;  %v946_v24 = vadd.f32 %v945_v22, %v944_v19  ;;  %v947_v26 = vpop.f32.mrb[2].mxu0 }
  0xf9   :  { %v968_v25 = vadd.f32 %v967_v23, %v966_v20  ;;  %v969_v27 = vpop.f32.mrb[2].mxu1  ;;  %v948_v28 = vpop.f32.mrb[3].mxu0 }
  0xfa   :  { %v970_v29 = vpop.f32.mrb[3].mxu1  ;;  %v611_v30 = vadd.f32 %v946_v24, %v848_v21 }
  0xfc   :  { %v651_v31 = vadd.f32 %v968_v25, %v611_v30 }
 0x116   :  { %v988_v32 = vpop.f32.mrb[4].mxu0 }
 0x117   :  { %v1010_v33 = vpop.f32.mrb[4].mxu1  ;;  %v989_v34 = vpop.f32.mrb[5].mxu0 }
 0x118   :  { %v1011_v35 = vpop.f32.mrb[5].mxu1  ;;  %v990_v36 = vadd.f32 %v989_v34, %v988_v32  ;;  %v991_v38 = vpop.f32.mrb[6].mxu0 }
 0x119   :  { %v1012_v37 = vadd.f32 %v1011_v35, %v1010_v33  ;;  %v1013_v39 = vpop.f32.mrb[6].mxu1  ;;  %v992_v40 = vpop.f32.mrb[7].mxu0 }
 0x11a   :  { %v1014_v41 = vpop.f32.mrb[7].mxu1  ;;  %v691_v42 = vadd.f32 %v990_v36, %v651_v31 }
 0x11c   :  { %v731_v43 = vadd.f32 %v1012_v37, %v691_v42 }
 0x11e   :  { %v736_v45 = vmax.f32 %v731_v43, 0.0 }
 0x120   :  { %v738_v46 = vmul.f32 %v737_v44, %v736_v45 }
 0x122   :  { %v739_v47 = vpack.c.bf16 %v738_v46, %v738_v46 }
 0x124   :  { %1036 = vmatmul.mubr.msk.bf16.vlgmr.msra.gmra.mrb[8].mxu0 %vm789_vm1, %v739_v47 }
 0x1f7   :  { %v827_v49 = vpop.f32.mrb[8].mxu0 }
 0x1f8   :  { %v828_v50 = vadd.f32 %v827_v49, %v752_v48  ;;  %v1037_v51 = vpop.f32.mrb[9].mxu0 }
 0x1f9   :  { %v830_v52 = vpop.f32.mrb[10].mxu0 }
 0x1fa   :  { %833 = vst [vmem:[#allocation2] sm:$0x3f] %v828_v50  ;;  %v1038_v53 = vpop.f32.mrb[11].mxu0 }
 0x1fb   :  { %1131 = shalt.err (!%p1128_p4)
}
 0x1fc   :  { %s1132_s5 = scalar_lea.hbm %s1431_s6, 128 }
 0x1fd   :  { %p1133_p5 = scmp.ne.s32.totalorder %s1431_s6, %s1132_s5  ;;  %p1136_p6 = scmp.lt.u32.totalorder %s1132_s5, %s1431_s6 }
 0x1ff   :  { %p1138_p7 = pnand %p1136_p6, %p1133_p5 }
 0x201   :  { %1141 = shalt.err (!%p1138_p7)
}
 0x202   :  { %843 = dma.vmem_to_hbm [thread:$0]  %s841_s28, 128, %s1431_s6, [#allocation3]  }
 0x203   :  { %1142 = dma.done.wait [#allocation3], 128  }
 0x204   :  { %1143 = vsyncadd [#allocation3], 4294967168 }
 0x205   :  { %847 = vsyncpa [#allocation3], 1 }

</bundles_post_ra>
